<compile_context>
chip_gen: v6e
topology: v6e:2x2x1
jax: 0.10.0
libtpu: 0.0.40
codegen_flags: <defaults>
</compile_context>

<pallas_src>
import functools

import jax
import jax.numpy as jnp
from jax.experimental import pallas as pl
from jax.experimental.pallas import tpu as pltpu


def _round_up(n, m):
    return (n + m - 1) // m * m


def _cdiv(a, b):
    return -(-a // b)


def mlp_kernel(x_ref, w1_ref, b1_ref, w2_ref, b2_ref, out_ref):
    # Layer 1: bf16 x bf16 -> f32 accumulate on the MXU; bias + ReLU in f32.
    h = jnp.dot(x_ref[...], w1_ref[...], preferred_element_type=jnp.float32)
    h = jnp.maximum(h + b1_ref[...], 0.0)
    # Layer 2: cast the (f32) hidden activation back to bf16 for the MXU.
    out = jnp.dot(h.astype(w2_ref.dtype), w2_ref[...],
                  preferred_element_type=jnp.float32)
    out_ref[...] = (out + b2_ref[...]).astype(out_ref.dtype)


def prepack_params(w1, b1, w2, b2, weight_dtype=jnp.bfloat16):
    """Pad params to (8,128)-dense tiles and cast weights to bf16 ONCE.

    Call this at module-init time and reuse the packed params for every
    forward call; re-packing per call doubles the dominant weight HBM traffic.
    """
    In, H = w1.shape
    C = w2.shape[1]
    Hp = _round_up(H, 128)   # 500 -> 512
    Cp = _round_up(C, 128)   # 10  -> 128 (lane-dense output slab)
    w1_p = jnp.zeros((In, Hp), weight_dtype).at[:, :H].set(w1.astype(weight_dtype))
    b1_p = jnp.zeros((1, Hp), jnp.float32).at[:, :H].set(
        b1.reshape(1, -1).astype(jnp.float32))
    w2_p = jnp.zeros((Hp, Cp), weight_dtype).at[:H, :C].set(w2.astype(weight_dtype))
    b2_p = jnp.zeros((1, Cp), jnp.float32).at[:, :C].set(
        b2.reshape(1, -1).astype(jnp.float32))
    return w1_p, b1_p, w2_p, b2_p


@functools.partial(jax.jit, static_argnames=("num_classes", "batch_tile"))
def mlp_forward_packed(x, w1_p, b1_p, w2_p, b2_p, *, num_classes,
                       batch_tile=512):
    """x: [B, In] f32; packed params from prepack_params(); returns [B, C] f32."""
    B, In = x.shape
    Hp = w1_p.shape[1]
    Cp = w2_p.shape[1]

    x_bf = x.astype(w1_p.dtype)

    # Batch tiling: bf16 sublane packing is 16 rows, so round to 16 and keep
    # tiles a multiple of 16. Balance tile sizes instead of padding to a fixed
    # tile, and force >=2 tiles for moderate batches so both v7x TCs get work.
    Bp = _round_up(B, 16)
    n_tiles = max(1, _cdiv(Bp, batch_tile))
    if Bp >= 256:
        n_tiles = max(n_tiles, 2)
    tb = _round_up(_cdiv(Bp, n_tiles), 16)
    n_tiles = _cdiv(Bp, tb)
    Bp = n_tiles * tb
    if Bp != B:
        x_bf = jnp.zeros((Bp, In), x_bf.dtype).at[:B].set(x_bf)

    flops = 2 * Bp * (In * Hp + Hp * Cp)
    bytes_accessed = (Bp * In * 2 + w1_p.size * 2 + w2_p.size * 2
                      + b1_p.size * 4 + b2_p.size * 4 + Bp * Cp * 4)

    out = pl.pallas_call(
        mlp_kernel,
        out_shape=jax.ShapeDtypeStruct((Bp, Cp), jnp.float32),
        grid_spec=pltpu.PrefetchScalarGridSpec(
            num_scalar_prefetch=0,
            grid=(n_tiles,),
            in_specs=[
                pl.BlockSpec((tb, In), lambda i: (i, 0)),   # x: batch-tiled
                pl.BlockSpec((In, Hp), lambda i: (0, 0)),   # w1: VMEM-resident
                pl.BlockSpec((1, Hp), lambda i: (0, 0)),    # b1
                pl.BlockSpec((Hp, Cp), lambda i: (0, 0)),   # w2
                pl.BlockSpec((1, Cp), lambda i: (0, 0)),    # b2
            ],
            out_specs=pl.BlockSpec((tb, Cp), lambda i: (i, 0)),
        ),
        compiler_params=pltpu.CompilerParams(
            dimension_semantics=("parallel",)),
        cost_estimate=pl.CostEstimate(
            flops=flops, transcendentals=0, bytes_accessed=bytes_accessed),
    )(x_bf, w1_p, b1_p, w2_p, b2_p)

    return out[:B, :num_classes]


def mlp_forward(x, w1, b1, w2, b2, *, batch_tile=512):
    """Convenience wrapper (packs per call — prefer prepack_params + packed)."""
    packed = prepack_params(w1, b1, w2, b2)
    return mlp_forward_packed(x, *packed, num_classes=w2.shape[1],
                              batch_tile=batch_tile)


def init_params(key, input_size, hidden_size, num_classes, dtype=jnp.float32):
    """Deterministic init mimicking nn.Linear's uniform(-1/sqrt(fan_in), ...)."""
    k1, k2, k3, k4 = jax.random.split(key, 4)
    bound1 = 1.0 / (input_size ** 0.5)
    bound2 = 1.0 / (hidden_size ** 0.5)
    w1 = jax.random.uniform(k1, (input_size, hidden_size), dtype, -bound1, bound1)
    b1 = jax.random.uniform(k2, (hidden_size,), dtype, -bound1, bound1)
    w2 = jax.random.uniform(k3, (hidden_size, num_classes), dtype, -bound2, bound2)
    b2 = jax.random.uniform(k4, (num_classes,), dtype, -bound2, bound2)
    return w1, b1, w2, b2


if __name__ == "__main__":
    inputSize = 28 * 28   # 784
    hiddenSize = 500
    numClasses = 10
    batch = 16

    key = jax.random.PRNGKey(0)
    kx, kp = jax.random.split(key)
    x = jax.random.normal(kx, (batch, inputSize), jnp.float32)
    w1, b1, w2, b2 = init_params(kp, inputSize, hiddenSize, numClasses)

    # Pre-pack the padded bf16 weights once (module-init style), reuse per call.
    packed = jax.block_until_ready(prepack_params(w1, b1, w2, b2))

    out = jax.block_until_ready(
        mlp_forward_packed(x, *packed, num_classes=numClasses))

    # Pure-JAX reference with the same bf16-input / f32-accumulate arithmetic.
    # (bf16 weights introduce ~1e-2 relative error vs the pure-f32 PyTorch
    # model — a deliberate bandwidth/accuracy trade-off.)
    xb = x.astype(jnp.bfloat16)
    w1b = w1.astype(jnp.bfloat16)
    w2b = w2.astype(jnp.bfloat16)
    h_ref = jnp.maximum(
        jnp.dot(xb, w1b, preferred_element_type=jnp.float32) + b1, 0.0)
    ref = jnp.dot(h_ref.astype(jnp.bfloat16), w2b,
                  preferred_element_type=jnp.float32) + b2

    assert out.shape == (batch, numClasses)
    assert jnp.allclose(out, ref, atol=1e-2, rtol=1e-2), \
        float(jnp.max(jnp.abs(out - ref)))

    print("KERNEL_OK")
</pallas_src>

<mosaic_0001>
module attributes {stable_mosaic.version = 11 : i64} {
  func.func @mlp_kernel(%arg0: i32, %arg1: memref<16x784xbf16, #tpu.memory_space<vmem>>, %arg2: memref<784x512xbf16, #tpu.memory_space<vmem>>, %arg3: memref<1x512xf32, #tpu.memory_space<vmem>>, %arg4: memref<512x128xbf16, #tpu.memory_space<vmem>>, %arg5: memref<1x128xf32, #tpu.memory_space<vmem>>, %arg6: memref<16x128xf32, #tpu.memory_space<vmem>>) attributes {dimension_semantics = [#tpu.dimension_semantics<parallel>], iteration_bounds = array<i64: 1>, scalar_prefetch = 0 : i64, scratch_operands = 0 : i64, tpu.core_type = #tpu.core_type<tc>, window_params = [{transform_indices = @transform_0, window_bounds = array<i64: 16, 784>}, {pipeline_mode = #tpu.pipeline_mode<synchronous>, transform_indices = @transform_1, window_bounds = array<i64: 784, 512>}, {pipeline_mode = #tpu.pipeline_mode<synchronous>, transform_indices = @transform_2, window_bounds = array<i64: 1, 512>}, {pipeline_mode = #tpu.pipeline_mode<synchronous>, transform_indices = @transform_3, window_bounds = array<i64: 512, 128>}, {pipeline_mode = #tpu.pipeline_mode<synchronous>, transform_indices = @transform_4, window_bounds = array<i64: 1, 128>}, {transform_indices = @transform_5, window_bounds = array<i64: 16, 128>}]} {
    %c0 = arith.constant 0 : index
    %c0_0 = arith.constant 0 : index
    %0 = vector.load %arg1[%c0, %c0_0] : memref<16x784xbf16, #tpu.memory_space<vmem>>, vector<16x784xbf16>
    %c0_1 = arith.constant 0 : index
    %c0_2 = arith.constant 0 : index
    %1 = vector.load %arg2[%c0_1, %c0_2] : memref<784x512xbf16, #tpu.memory_space<vmem>>, vector<784x512xbf16>
    %cst = arith.constant dense<0.000000e+00> : vector<16x512xf32>
    %2 = tpu.matmul %0, %1, %cst {dimension_numbers = #tpu.dot_dimension_numbers<[1], [0], [0], [1], [0, 0, 1, 1], [], []>} : vector<16x784xbf16>, vector<784x512xbf16>, vector<16x512xf32> -> vector<16x512xf32>
    %c0_3 = arith.constant 0 : index
    %c0_4 = arith.constant 0 : index
    %3 = vector.load %arg3[%c0_3, %c0_4] : memref<1x512xf32, #tpu.memory_space<vmem>>, vector<1x512xf32>
    %4 = vector.broadcast %3 : vector<1x512xf32> to vector<16x512xf32>
    %5 = arith.addf %2, %4 : vector<16x512xf32>
    %cst_5 = arith.constant 0.000000e+00 : f32
    %6 = vector.broadcast %cst_5 : f32 to vector<16x512xf32>
    %7 = arith.maximumf %5, %6 : vector<16x512xf32>
    %8 = arith.truncf %7 : vector<16x512xf32> to vector<16x512xbf16>
    %c0_6 = arith.constant 0 : index
    %c0_7 = arith.constant 0 : index
    %9 = vector.load %arg4[%c0_6, %c0_7] : memref<512x128xbf16, #tpu.memory_space<vmem>>, vector<512x128xbf16>
    %cst_8 = arith.constant dense<0.000000e+00> : vector<16x128xf32>
    %10 = tpu.matmul %8, %9, %cst_8 {dimension_numbers = #tpu.dot_dimension_numbers<[1], [0], [0], [1], [0, 0, 1, 1], [], []>} : vector<16x512xbf16>, vector<512x128xbf16>, vector<16x128xf32> -> vector<16x128xf32>
    %c0_9 = arith.constant 0 : index
    %c0_10 = arith.constant 0 : index
    %11 = vector.load %arg5[%c0_9, %c0_10] : memref<1x128xf32, #tpu.memory_space<vmem>>, vector<1x128xf32>
    %12 = vector.broadcast %11 : vector<1x128xf32> to vector<16x128xf32>
    %13 = arith.addf %10, %12 : vector<16x128xf32>
    %c0_11 = arith.constant 0 : index
    %c0_12 = arith.constant 0 : index
    %14 = vector.load %arg6[%c0_11, %c0_12] : memref<16x128xf32, #tpu.memory_space<vmem>>, vector<16x128xf32>
    tpu.vector_store %arg6[%c0_11, %c0_12], %13 {strides = array<i32>} : memref<16x128xf32, #tpu.memory_space<vmem>>, vector<16x128xf32>,
    return
  }
  func.func @transform_0(%arg0: i32) -> (i32, i32) {
    %c0_i32 = arith.constant 0 : i32
    %c0_i32_0 = arith.constant 0 : i32
    return %arg0, %c0_i32 : i32, i32
  }
  func.func @transform_1(%arg0: i32) -> (i32, i32) {
    %c0_i32 = arith.constant 0 : i32
    %c0_i32_0 = arith.constant 0 : i32
    %c0_i32_1 = arith.constant 0 : i32
    return %c0_i32, %c0_i32_0 : i32, i32
  }
  func.func @transform_2(%arg0: i32) -> (i32, i32) {
    %c0_i32 = arith.constant 0 : i32
    %c0_i32_0 = arith.constant 0 : i32
    %c0_i32_1 = arith.constant 0 : i32
    return %c0_i32, %c0_i32_0 : i32, i32
  }
  func.func @transform_3(%arg0: i32) -> (i32, i32) {
    %c0_i32 = arith.constant 0 : i32
    %c0_i32_0 = arith.constant 0 : i32
    %c0_i32_1 = arith.constant 0 : i32
    return %c0_i32, %c0_i32_0 : i32, i32
  }
  func.func @transform_4(%arg0: i32) -> (i32, i32) {
    %c0_i32 = arith.constant 0 : i32
    %c0_i32_0 = arith.constant 0 : i32
    %c0_i32_1 = arith.constant 0 : i32
    return %c0_i32, %c0_i32_0 : i32, i32
  }
  func.func @transform_5(%arg0: i32) -> (i32, i32) {
    %c0_i32 = arith.constant 0 : i32
    %c0_i32_0 = arith.constant 0 : i32
    return %arg0, %c0_i32 : i32, i32
  }
}

</mosaic_0001>

<bundles_post_ra>
// kernel: mlp_forward_packed.1
= control target key start
LH: loop header
LB: loop body
LE: loop exit
PB: predicated region body
PF: predicated region fallthrough
CT: control target
= control target key end

     0   :  { %10 = vsyncpa [#allocation3], 0  ;;  %s2818_s0 = inlined_call_operand.vmem [shape: bf16[16,784], index: 0, kind: input, shape index: {}]   ;;  %s2819_s1 = inlined_call_operand.hbm [shape: bf16[784,512], index: 1, kind: input, shape index: {}]   ;;  %s2820_s2 = inlined_call_operand.vmem [shape: f32[1,512], index: 2, kind: input, shape index: {}]   ;;  %s2821_s3 = inlined_call_operand.hbm [shape: bf16[512,128], index: 3, kind: input, shape index: {}]   ;;  %s2822_s4 = inlined_call_operand.vmem [shape: f32[1,128], index: 4, kind: input, shape index: {}]   ;;  %s2823_s5 = inlined_call_operand.hbm [shape: f32[16,128], index: 5, kind: output, shape index: {}]  }
   0x1   :  { %11 = vsyncpa [#allocation6], 0 }
   0x2   :  { %12 = vsyncpa [#allocation4], 0  ;;  %s2710_s18 = smov [#allocation2]  }
   0x3   :  { %s20_s19 = sshll.u32 %s2710_s18, 4  ;;  %s21_s19 = int_to_ptr.vmem [resolvable:$true] %s20_s19 }
   0x4   :  { %s2652_s20 = scalar_lea.vmem %s21_s19, 25088  ;;  %p2657_p1 = scmp.lt.s32.totalorder %s21_s19, %s21_s19 }
   0x5   :  { %p2653_p0 = scmp.ne.s32.totalorder %s21_s19, %s2652_s20  ;;  %p2658_p2 = scmp.lt.s32.totalorder %s2652_s20, %s2652_s20 }
   0x7   :  { %p2659_p3 = por %p2658_p2, %p2657_p1 }
   0x9   :  { %p2660_p4 = pnand %p2659_p3, %p2653_p0 }
   0xb   :  { %2663 = shalt.err (!%p2660_p4)
}
   0xc   :  { %s2711_s21 = smov 256   ;;  %s2712_s22 = smov 16  }
   0xd   :  { %26 = dma.hbm_to_vmem [thread:$0]  %s2819_s1, 25088, %s21_s19, [#allocation3], %s2711_s21, %s2711_s21, %s2712_s22  }
   0xe   :  { %s2713_s25 = smov [#allocation5]  }
   0xf   :  { %s34_s26 = sshll.u32 %s2713_s25, 4  ;;  %s35_s26 = int_to_ptr.vmem [resolvable:$true] %s34_s26 }
  0x10   :  { %s2672_s27 = scalar_lea.vmem %s35_s26, 4096  ;;  %p2677_p6 = scmp.lt.s32.totalorder %s35_s26, %s35_s26 }
  0x11   :  { %p2673_p5 = scmp.ne.s32.totalorder %s35_s26, %s2672_s27  ;;  %p2678_p7 = scmp.lt.s32.totalorder %s2672_s27, %s2672_s27 }
  0x13   :  { %p2679_p8 = por %p2678_p7, %p2677_p6 }
  0x15   :  { %p2680_p9 = pnand %p2679_p8, %p2673_p5 }
  0x17   :  { %2683 = shalt.err (!%p2680_p9)
}
  0x18   :  { %s2714_s28 = smov 64   ;;  %s2715_s29 = smov 4  }
  0x19   :  { %40 = dma.hbm_to_vmem [thread:$0]  %s2821_s3, 4096, %s35_s26, [#allocation6], %s2714_s28, %s2714_s28, %s2715_s29  }
  0x1a   :  { %2704 = dma.done.wait [#allocation3], 25088  }
  0x1b   :  { %2705 = vsyncadd [#allocation3], 4294942208 }
  0x1c   :  { %2706 = dma.done.wait [#allocation6], 4096  }
  0x1d   :  { %2707 = vsyncadd [#allocation6], 4294963200  ;;  %v2308_v0 = vld [vmem:[#allocation2 + $0xe4] ss:$16 sps:$4 sm:$0xff]   ;;  %v2312_v2 = vld [vmem:[#allocation2 + $0xe0] ss:$16 sps:$4 sm:$0xff]  }
  0x1e   :  { %v2310_v1 = vld [vmem:[#allocation2 + $0x2e4] ss:$16 sps:$4 sm:$0xff]   ;;  %1295 = vmatprep.subr.bf16.mxu0 %v2308_v0  ;;  %v2313_v3 = vld [vmem:[#allocation2 + $0x2e0] ss:$16 sps:$4 sm:$0xff]   ;;  %v2764_v51 = vld [vmem:[%s2818_s0 + $0xc] ss:$28 sps:$4 sm:$0xff]  }
  0x1f   :  { %1338 = vmatprep.subr.bf16.mxu1 %v2310_v1  ;;  %v2314_v4 = vld [vmem:[#allocation2 + $0xc4] ss:$16 sps:$4 sm:$0xff]   ;;  %1296 = vmatpush1.bf16.msra.mxu0 %v2312_v2  ;;  %v2318_v6 = vld [vmem:[#allocation2 + $0xc0] ss:$16 sps:$4 sm:$0xff]   ;;  %vm1291_vm0 = vcmask 130048   ;;  %s2717_s21 = smov [#allocation7]  }
  0x20   :  { %1339 = vmatpush1.bf16.msra.mxu1 %v2313_v3  ;;  %v2316_v5 = vld [vmem:[#allocation2 + $0x2c4] ss:$16 sps:$4 sm:$0xff]   ;;  %1297 = vmatprep.subr.bf16.mxu0 %v2314_v4  ;;  %v2319_v7 = vld [vmem:[#allocation2 + $0x2c0] ss:$16 sps:$4 sm:$0xff]   ;;  %s2003_s22 = sshll.u32 %s2717_s21, 4  ;;  %s2004_s22 = int_to_ptr.vmem [resolvable:$true] %s2003_s22 }
  0x21   :  { %1340 = vmatprep.subr.bf16.mxu1 %v2316_v5  ;;  %v2320_v8 = vld [vmem:[#allocation2 + $0xa4] ss:$16 sps:$4 sm:$0xff]   ;;  %v2324_v10 = vld [vmem:[#allocation2 + $0xa0] ss:$16 sps:$4 sm:$0xff]   ;;  %1370 = vmatprep.mubr.bf16.mxu1 %v2764_v51  ;;  %s2684_s23 = scalar_lea.vmem %s2004_s22, 256  ;;  %p2689_p11 = scmp.lt.s32.totalorder %s2004_s22, %s2004_s22 }
  0x22   :  { %v2322_v9 = vld [vmem:[#allocation2 + $0x2a4] ss:$16 sps:$4 sm:$0xff]   ;;  %v2325_v11 = vld [vmem:[#allocation2 + $0x2a0] ss:$16 sps:$4 sm:$0xff]   ;;  %p2685_p10 = scmp.ne.s32.totalorder %s2004_s22, %s2684_s23  ;;  %p2690_p12 = scmp.lt.s32.totalorder %s2684_s23, %s2684_s23 }
  0x23   :  { %1298 = vmatpush1.bf16.msra.mxu0 %v2318_v6  ;;  %v2326_v12 = vld [vmem:[#allocation2 + $0x84] ss:$16 sps:$4 sm:$0xff]   ;;  %v2330_v14 = vld [vmem:[#allocation2 + $0x80] ss:$16 sps:$4 sm:$0xff]  }
  0x24   :  { %1341 = vmatpush1.bf16.msra.mxu1 %v2319_v7  ;;  %1299 = vmatprep.subr.bf16.mxu0 %v2320_v8  ;;  %v2328_v13 = vld [vmem:[#allocation2 + $0x284] ss:$16 sps:$4 sm:$0xff]   ;;  %v2331_v15 = vld [vmem:[#allocation2 + $0x280] ss:$16 sps:$4 sm:$0xff]   ;;  %p2691_p13 = por %p2690_p12, %p2689_p11 }
  0x25   :  { %1342 = vmatprep.subr.bf16.mxu1 %v2322_v9  ;;  %v2332_v16 = vld [vmem:[#allocation2 + $0x64] ss:$16 sps:$4 sm:$0xff]   ;;  %v2336_v18 = vld [vmem:[#allocation2 + $0x60] ss:$16 sps:$4 sm:$0xff]   ;;  %v2421_v9 = vld [vmem:[#allocation2 + $0xec] ss:$16 sps:$4 sm:$0xff]  }
  0x26   :  { %v2334_v17 = vld [vmem:[#allocation2 + $0x264] ss:$16 sps:$4 sm:$0xff]   ;;  %v2337_v19 = vld [vmem:[#allocation2 + $0x260] ss:$16 sps:$4 sm:$0xff]   ;;  %p2692_p0 = pnand %p2691_p13, %p2685_p10 }
  0x27   :  { %1300 = vmatpush1.bf16.msra.mxu0 %v2324_v10  ;;  %v2338_v20 = vld [vmem:[#allocation2 + $0x44] ss:$16 sps:$4 sm:$0xff]   ;;  %v2342_v22 = vld [vmem:[#allocation2 + $0x40] ss:$16 sps:$4 sm:$0xff]  }
  0x28   :  { %1343 = vmatpush1.bf16.msra.mxu1 %v2325_v11  ;;  %1301 = vmatprep.subr.bf16.mxu0 %v2326_v12  ;;  %v2340_v21 = vld [vmem:[#allocation2 + $0x244] ss:$16 sps:$4 sm:$0xff]   ;;  %v2343_v23 = vld [vmem:[#allocation2 + $0x240] ss:$16 sps:$4 sm:$0xff]   ;;  %v2716_v11 = vmov 0  }
  0x29   :  { %1344 = vmatprep.subr.bf16.mxu1 %v2328_v13  ;;  %v2344_v24 = vld [vmem:[#allocation2 + $0x24] ss:$16 sps:$4 sm:$0xff]   ;;  %v2348_v26 = vld [vmem:[#allocation2 + $0x20] ss:$16 sps:$4 sm:$0xff]   ;;  %v2419_v13 = vld [vmem:[#allocation2 + $0xe8] ss:$16 sps:$4 sm:$0xff]  }
  0x2a   :  { %v2346_v25 = vld [vmem:[#allocation2 + $0x224] ss:$16 sps:$4 sm:$0xff]   ;;  %v2349_v27 = vld [vmem:[#allocation2 + $0x220] ss:$16 sps:$4 sm:$0xff]  }
  0x2b   :  { %1302 = vmatpush1.bf16.msra.mxu0 %v2330_v14  ;;  %v2350_v28 = vld [vmem:[#allocation2 + $0x4] ss:$16 sps:$4 sm:$0xff]   ;;  %v2354_v30 = vld [vmem:[#allocation2] ss:$16 sps:$4 sm:$0xff]  }
  0x2c   :  { %1345 = vmatpush1.bf16.msra.mxu1 %v2331_v15  ;;  %1303 = vmatprep.subr.bf16.mxu0 %v2332_v16  ;;  %v2352_v29 = vld [vmem:[#allocation2 + $0x204] ss:$16 sps:$4 sm:$0xff]   ;;  %v2355_v31 = vld [vmem:[#allocation2 + $0x200] ss:$16 sps:$4 sm:$0xff]   ;;  %v2428_v16 = vld [vmem:[#allocation2 + $0xcc] ss:$16 sps:$4 sm:$0xff]  }
  0x2d   :  { %1346 = vmatprep.subr.bf16.mxu1 %v2334_v17  ;;  %v2356_v32 = vld [vmem:[#allocation2 + $0x1e4] ss:$16 sps:$4 sm:$0xff]   ;;  %v2360_v34 = vld [vmem:[#allocation2 + $0x1e0] ss:$16 sps:$4 sm:$0xff]  }
  0x2e   :  { %v2358_v33 = vld [vmem:[#allocation2 + $0x3e4] ss:$16 sps:$4 sm:$0xff]   ;;  %v2361_v35 = vld [vmem:[#allocation2 + $0x3e0] ss:$16 sps:$4 sm:$0xff]  }
  0x2f   :  { %1304 = vmatpush1.bf16.msra.mxu0 %v2336_v18  ;;  %v2362_v36 = vld [vmem:[#allocation2 + $0x1c4] ss:$16 sps:$4 sm:$0xff]   ;;  %v2366_v38 = vld [vmem:[#allocation2 + $0x1c0] ss:$16 sps:$4 sm:$0xff]   ;;  %v2426_v18 = vld [vmem:[#allocation2 + $0xc8] ss:$16 sps:$4 sm:$0xff]  }
  0x30   :  { %1347 = vmatpush1.bf16.msra.mxu1 %v2337_v19  ;;  %1305 = vmatprep.subr.bf16.mxu0 %v2338_v20  ;;  %v2364_v37 = vld [vmem:[#allocation2 + $0x3c4] ss:$16 sps:$4 sm:$0xff]   ;;  %v2367_v39 = vld [vmem:[#allocation2 + $0x3c0] ss:$16 sps:$4 sm:$0xff]   ;;  %v2434_v20 = vld [vmem:[#allocation2 + $0xac] ss:$16 sps:$4 sm:$0xff]  }
  0x31   :  { %1348 = vmatprep.subr.bf16.mxu1 %v2340_v21  ;;  %v2368_v40 = vld [vmem:[#allocation2 + $0x1a4] ss:$16 sps:$4 sm:$0xff]   ;;  %v2372_v42 = vld [vmem:[#allocation2 + $0x1a0] ss:$16 sps:$4 sm:$0xff]  }
  0x32   :  { %v2370_v41 = vld [vmem:[#allocation2 + $0x3a4] ss:$16 sps:$4 sm:$0xff]   ;;  %v2373_v43 = vld [vmem:[#allocation2 + $0x3a0] ss:$16 sps:$4 sm:$0xff]  }
  0x33   :  { %1306 = vmatpush1.bf16.msra.mxu0 %v2342_v22  ;;  %v2374_v44 = vld [vmem:[#allocation2 + $0x184] ss:$16 sps:$4 sm:$0xff]   ;;  %v2378_v46 = vld [vmem:[#allocation2 + $0x180] ss:$16 sps:$4 sm:$0xff]   ;;  %v2432_v22 = vld [vmem:[#allocation2 + $0xa8] ss:$16 sps:$4 sm:$0xff]  }
  0x34   :  { %1349 = vmatpush1.bf16.msra.mxu1 %v2343_v23  ;;  %1307 = vmatprep.subr.bf16.mxu0 %v2344_v24  ;;  %v2376_v45 = vld [vmem:[#allocation2 + $0x384] ss:$16 sps:$4 sm:$0xff]   ;;  %v2379_v47 = vld [vmem:[#allocation2 + $0x380] ss:$16 sps:$4 sm:$0xff]   ;;  %v2440_v24 = vld [vmem:[#allocation2 + $0x8c] ss:$16 sps:$4 sm:$0xff]  }
  0x35   :  { %1350 = vmatprep.subr.bf16.mxu1 %v2346_v25  ;;  %v2380_v48 = vld [vmem:[#allocation2 + $0x164] ss:$16 sps:$4 sm:$0xff]   ;;  %v2384_v52 = vld [vmem:[#allocation2 + $0x160] ss:$16 sps:$4 sm:$0xff]  }
  0x36   :  { %v2759_v49 = vld [vmem:[%s2818_s0 + $0x4] ss:$28 sps:$4 sm:$0xff]   ;;  %v2784_v14 = vld [vmem:[%s2818_s0 + $0x18] ss:$28 sps:$4 sm:$0xff]  }
  0x37   :  { %1308 = vmatpush1.bf16.msra.mxu0 %v2348_v26  ;;  %v2382_v50 = vld [vmem:[#allocation2 + $0x364] ss:$16 sps:$4 sm:$0xff]   ;;  %1327 = vmatprep.mubr.bf16.mxu0 %v2759_v49  ;;  %v2385_v53 = vld [vmem:[#allocation2 + $0x360] ss:$16 sps:$4 sm:$0xff]   ;;  %v2438_v26 = vld [vmem:[#allocation2 + $0x88] ss:$16 sps:$4 sm:$0xff]  }
  0x38   :  { %1351 = vmatpush1.bf16.msra.mxu1 %v2349_v27  ;;  %1309 = vmatprep.subr.bf16.mxu0 %v2350_v28  ;;  %v2386_v54 = vld [vmem:[#allocation2 + $0x144] ss:$16 sps:$4 sm:$0xff]   ;;  %v2390_v56 = vld [vmem:[#allocation2 + $0x140] ss:$16 sps:$4 sm:$0xff]   ;;  %v2446_v28 = vld [vmem:[#allocation2 + $0x6c] ss:$16 sps:$4 sm:$0xff]  }
  0x39   :  { %1352 = vmatprep.subr.bf16.mxu1 %v2352_v29  ;;  %v2388_v55 = vld [vmem:[#allocation2 + $0x344] ss:$16 sps:$4 sm:$0xff]   ;;  %v2391_v57 = vld [vmem:[#allocation2 + $0x340] ss:$16 sps:$4 sm:$0xff]  }
  0x3a   :  { %v2392_v58 = vld [vmem:[#allocation2 + $0x124] ss:$16 sps:$4 sm:$0xff]   ;;  %v2396_v60 = vld [vmem:[#allocation2 + $0x120] ss:$16 sps:$4 sm:$0xff]  }
  0x3b   :  { %1310 = vmatpush1.bf16.msra.mxu0 %v2354_v30  ;;  %v2394_v59 = vld [vmem:[#allocation2 + $0x324] ss:$16 sps:$4 sm:$0xff]   ;;  %v2397_v61 = vld [vmem:[#allocation2 + $0x320] ss:$16 sps:$4 sm:$0xff]   ;;  %v2444_v30 = vld [vmem:[#allocation2 + $0x68] ss:$16 sps:$4 sm:$0xff]  }
  0x3c   :  { %1353 = vmatpush1.bf16.msra.mxu1 %v2355_v31  ;;  %1311 = vmatprep.subr.bf16.mxu0 %v2356_v32  ;;  %v2398_v62 = vld [vmem:[#allocation2 + $0x104] ss:$16 sps:$4 sm:$0xff]   ;;  %v2402_v0 = vld [vmem:[#allocation2 + $0x100] ss:$16 sps:$4 sm:$0xff]   ;;  %v2452_v32 = vld [vmem:[#allocation2 + $0x4c] ss:$16 sps:$4 sm:$0xff]  }
  0x3d   :  { %1354 = vmatprep.subr.bf16.mxu1 %v2358_v33  ;;  %v2400_v63 = vld [vmem:[#allocation2 + $0x304] ss:$16 sps:$4 sm:$0xff]   ;;  %v2403_v1 = vld [vmem:[#allocation2 + $0x300] ss:$16 sps:$4 sm:$0xff]  }
  0x3e   :  { %v2412_v2 = vld [vmem:[#allocation2 + $0x4e4] ss:$16 sps:$4 sm:$0xff]   ;;  %v2771_v4 = vld [vmem:[%s2818_s0] ss:$28 sps:$4 sm:$0xff]  }
  0x3f   :  { %1312 = vmatpush2.bf16.msra.mxu0 %v2360_v34  ;;  %v2415_v3 = vld [vmem:[#allocation2 + $0x604] ss:$16 sps:$4 sm:$0xff]   ;;  %v2410_v6 = vld [vmem:[#allocation2 + $0x4e0] ss:$16 sps:$4 sm:$0xff]  }
  0x40   :  { %1355 = vmatpush2.bf16.msra.mxu1 %v2361_v35  ;;  %1313 = vmatprep.subr.bf16.mxu0 %v2362_v36  ;;  %v2776_v5 = vld [vmem:[%s2818_s0 + $0x8] ss:$28 sps:$4 sm:$0xff]   ;;  %v2413_v7 = vld [vmem:[#allocation2 + $0x600] ss:$16 sps:$4 sm:$0xff]  }
  0x41   :  { %1356 = vmatprep.subr.bf16.mxu1 %v2364_v37  ;;  %v2418_v8 = vld [vmem:[#allocation2 + $0x4c4] ss:$16 sps:$4 sm:$0xff]   ;;  %v2416_v10 = vld [vmem:[#allocation2 + $0x4c0] ss:$16 sps:$4 sm:$0xff]   ;;  %v2450_v35 = vld [vmem:[#allocation2 + $0x48] ss:$16 sps:$4 sm:$0xff]  }
  0x42   :  { %v2424_v12 = vld [vmem:[#allocation2 + $0x4a4] ss:$16 sps:$4 sm:$0xff]   ;;  %v2422_v15 = vld [vmem:[#allocation2 + $0x4a0] ss:$16 sps:$4 sm:$0xff]   ;;  %v2458_v37 = vld [vmem:[#allocation2 + $0x2c] ss:$16 sps:$4 sm:$0xff]  }
  0x43   :  { %1314 = vmatpush2.bf16.msra.mxu0 %v2366_v38  ;;  %v2431_v17 = vld [vmem:[#allocation2 + $0x484] ss:$16 sps:$4 sm:$0xff]   ;;  %v2429_v19 = vld [vmem:[#allocation2 + $0x480] ss:$16 sps:$4 sm:$0xff]  }
  0x44   :  { %1357 = vmatpush2.bf16.msra.mxu1 %v2367_v39  ;;  %1315 = vmatprep.subr.bf16.mxu0 %v2368_v40  ;;  %v2437_v21 = vld [vmem:[#allocation2 + $0x464] ss:$16 sps:$4 sm:$0xff]   ;;  %v2435_v23 = vld [vmem:[#allocation2 + $0x460] ss:$16 sps:$4 sm:$0xff]   ;;  %v2456_v39 = vld [vmem:[#allocation2 + $0x28] ss:$16 sps:$4 sm:$0xff]  }
  0x45   :  { %1358 = vmatprep.subr.bf16.mxu1 %v2370_v41  ;;  %v2443_v25 = vld [vmem:[#allocation2 + $0x444] ss:$16 sps:$4 sm:$0xff]   ;;  %v2441_v27 = vld [vmem:[#allocation2 + $0x440] ss:$16 sps:$4 sm:$0xff]   ;;  %v2464_v41 = vld [vmem:[#allocation2 + $0xc] ss:$16 sps:$4 sm:$0xff]  }
  0x46   :  { %v2449_v29 = vld [vmem:[#allocation2 + $0x424] ss:$16 sps:$4 sm:$0xff]   ;;  %v2447_v31 = vld [vmem:[#allocation2 + $0x420] ss:$16 sps:$4 sm:$0xff]  }
  0x47   :  { %1316 = vmatpush2.bf16.msra.mxu0 %v2372_v42  ;;  %v2792_v33 = vld [vmem:[%s2818_s0 + $0x14] ss:$28 sps:$4 sm:$0xff]  }
  0x48   :  { %1359 = vmatpush2.bf16.msra.mxu1 %v2373_v43  ;;  %1317 = vmatprep.subr.bf16.mxu0 %v2374_v44  ;;  %v2455_v34 = vld [vmem:[#allocation2 + $0x404] ss:$16 sps:$4 sm:$0xff]   ;;  %v2453_v36 = vld [vmem:[#allocation2 + $0x400] ss:$16 sps:$4 sm:$0xff]   ;;  %v2462_v43 = vld [vmem:[#allocation2 + $0x8] ss:$16 sps:$4 sm:$0xff]  }
  0x49   :  { %1360 = vmatprep.subr.bf16.mxu1 %v2376_v45  ;;  %v2461_v38 = vld [vmem:[#allocation2 + $0x5e4] ss:$16 sps:$4 sm:$0xff]   ;;  %v2459_v40 = vld [vmem:[#allocation2 + $0x5e0] ss:$16 sps:$4 sm:$0xff]   ;;  %v2470_v45 = vld [vmem:[#allocation2 + $0x1ec] ss:$16 sps:$4 sm:$0xff]  }
  0x4a   :  { %v2467_v42 = vld [vmem:[#allocation2 + $0x5c4] ss:$16 sps:$4 sm:$0xff]   ;;  %v2465_v44 = vld [vmem:[#allocation2 + $0x5c0] ss:$16 sps:$4 sm:$0xff]  }
  0x4b   :  { %1318 = vmatpush2.bf16.msra.mxu0 %v2378_v46  ;;  %v2473_v46 = vld [vmem:[#allocation2 + $0x5a4] ss:$16 sps:$4 sm:$0xff]  }
  0x4c   :  { %1361 = vmatpush2.bf16.msra.mxu1 %v2379_v47  ;;  %1319 = vmatprep.subr.bf16.mxu0 %v2380_v48  ;;  %v2468_v47 = vld [vmem:[#allocation2 + $0x1e8] ss:$16 sps:$4 sm:$0xff]   ;;  %v2471_v48 = vld [vmem:[#allocation2 + $0x5a0] ss:$16 sps:$4 sm:$0xff]  }
  0x4d   :  { %1362 = vmatprep.subr.bf16.mxu1 %v2382_v50  ;;  %v2479_v50 = vld [vmem:[#allocation2 + $0x584] ss:$16 sps:$4 sm:$0xff]  }
  0x4f   :  { %1320 = vmatpush2.bf16.msra.mxu0 %v2384_v52  ;;  %v2474_v52 = vld [vmem:[#allocation2 + $0x1c8] ss:$16 sps:$4 sm:$0xff]  }
  0x50   :  { %1363 = vmatpush2.bf16.msra.mxu1 %v2385_v53  ;;  %1321 = vmatprep.subr.bf16.mxu0 %v2386_v54  ;;  %v2477_v53 = vld [vmem:[#allocation2 + $0x580] ss:$16 sps:$4 sm:$0xff]   ;;  %v2482_v54 = vld [vmem:[#allocation2 + $0x1ac] ss:$16 sps:$4 sm:$0xff]  }
  0x51   :  { %1364 = vmatprep.subr.bf16.mxu1 %v2388_v55  ;;  %v2485_v55 = vld [vmem:[#allocation2 + $0x564] ss:$16 sps:$4 sm:$0xff]  }
  0x53   :  { %1322 = vmatpush2.bf16.msra.mxu0 %v2390_v56  ;;  %v2480_v56 = vld [vmem:[#allocation2 + $0x1a8] ss:$16 sps:$4 sm:$0xff]  }
  0x54   :  { %1365 = vmatpush2.bf16.msra.mxu1 %v2391_v57  ;;  %1323 = vmatprep.subr.bf16.mxu0 %v2392_v58  ;;  %v2483_v57 = vld [vmem:[#allocation2 + $0x560] ss:$16 sps:$4 sm:$0xff]   ;;  %v2488_v58 = vld [vmem:[#allocation2 + $0x18c] ss:$16 sps:$4 sm:$0xff]  }
  0x55   :  { %1366 = vmatprep.subr.bf16.mxu1 %v2394_v59  ;;  %v2491_v59 = vld [vmem:[#allocation2 + $0x544] ss:$16 sps:$4 sm:$0xff]  }
  0x57   :  { %1324 = vmatpush2.bf16.msra.mxu0 %v2396_v60  ;;  %v2486_v60 = vld [vmem:[#allocation2 + $0x188] ss:$16 sps:$4 sm:$0xff]  }
  0x58   :  { %1367 = vmatpush2.bf16.msra.mxu1 %v2397_v61  ;;  %1325 = vmatprep.subr.bf16.mxu0 %v2398_v62  ;;  %v2489_v61 = vld [vmem:[#allocation2 + $0x540] ss:$16 sps:$4 sm:$0xff]   ;;  %v2494_v62 = vld [vmem:[#allocation2 + $0x16c] ss:$16 sps:$4 sm:$0xff]  }
  0x59   :  { %1368 = vmatprep.subr.bf16.mxu1 %v2400_v63  ;;  %v2497_v63 = vld [vmem:[#allocation2 + $0x524] ss:$16 sps:$4 sm:$0xff]  }
  0x5b   :  { %1326 = vmatpush2.bf16.msra.mxu0 %v2402_v0  ;;  %v2492_v0 = vld [vmem:[#allocation2 + $0x168] ss:$16 sps:$4 sm:$0xff]  }
  0x5c   :  { %1369 = vmatpush2.bf16.msra.mxu1 %v2403_v1  ;;  %1381 = vmatprep.subr.bf16.mxu0 %v2412_v2  ;;  %v2495_v1 = vld [vmem:[#allocation2 + $0x520] ss:$16 sps:$4 sm:$0xff]   ;;  %v2500_v2 = vld [vmem:[#allocation2 + $0x14c] ss:$16 sps:$4 sm:$0xff]  }
  0x5d   :  { %1438 = vmatprep.subr.bf16.mxu1 %v2415_v3  ;;  %v2503_v3 = vld [vmem:[#allocation2 + $0x504] ss:$16 sps:$4 sm:$0xff]  }
  0x5e   :  { %1328 = vmatmul.mubr.bf16.vlgmr.msra.gmra.mxu0 %v2771_v4 }
  0x5f   :  { %1371 = vmatmul.mubr.bf16.vlgmr.msra.gmra.mxu1 %v2776_v5  ;;  %1382 = vmatpush1.bf16.msra.mxu0 %v2410_v6  ;;  %v2498_v6 = vld [vmem:[#allocation2 + $0x148] ss:$16 sps:$4 sm:$0xff]  }
  0x60   :  { %1439 = vmatpush1.bf16.msra.mxu1 %v2413_v7  ;;  %1383 = vmatprep.subr.bf16.mxu0 %v2418_v8  ;;  %v2501_v7 = vld [vmem:[#allocation2 + $0x500] ss:$16 sps:$4 sm:$0xff]   ;;  %v2509_v8 = vld [vmem:[#allocation2 + $0x12c] ss:$16 sps:$4 sm:$0xff]  }
  0x61   :  { %1456 = vmatprep.mubr.bf16.mxu1 %v2716_v11  ;;  %1467 = vmatprep.subr.bf16.mxu1 %v2421_v9  ;;  %v2512_v9 = vld [vmem:[#allocation2 + $0x2ec] ss:$16 sps:$4 sm:$0xff]  }
  0x62   :  { %1413 = vmatprep.mubr.bf16.mxu0 %v2792_v33 }
  0x63   :  { %1384 = vmatpush1.bf16.msra.mxu0 %v2416_v10  ;;  %v2798_v10 = vld [vmem:[%s2818_s0 + $0x10] ss:$28 sps:$4 sm:$0xff]  }
  0x64   :  { %1385 = vmatprep.subr.bf16.mxu0 %v2424_v12  ;;  %v2507_v12 = vld [vmem:[#allocation2 + $0x128] ss:$16 sps:$4 sm:$0xff]  }
  0x67   :  { %2219 = vmatmul.mubr.msk.bf16.vlgmr.msra.gmra.mxu1 %vm1291_vm0, %v2784_v14  ;;  %1386 = vmatpush1.bf16.msra.mxu0 %v2422_v15  ;;  %v2515_v15 = vld [vmem:[#allocation2 + $0x10c] ss:$16 sps:$4 sm:$0xff]  }
  0x68   :  { %1468 = vmatpush1.bf16.msra.mxu1 %v2419_v13  ;;  %1387 = vmatprep.subr.bf16.mxu0 %v2431_v17  ;;  %v2510_v13 = vld [vmem:[#allocation2 + $0x2e8] ss:$16 sps:$4 sm:$0xff]  }
  0x69   :  { %1469 = vmatprep.subr.bf16.mxu1 %v2428_v16  ;;  %1499 = vmatprep.mubr.bf16.mxu1 %v2759_v49  ;;  %v2476_v49 = vld [vmem:[#allocation2 + $0x1cc] ss:$16 sps:$4 sm:$0xff]   ;;  %v2513_v17 = vld [vmem:[#allocation2 + $0x108] ss:$16 sps:$4 sm:$0xff]  }
  0x6a   :  { %v2518_v16 = vld [vmem:[#allocation2 + $0x2cc] ss:$16 sps:$4 sm:$0xff]  }
  0x6b   :  { %1388 = vmatpush1.bf16.msra.mxu0 %v2429_v19  ;;  %v2521_v19 = vld [vmem:[#allocation2 + $0x4ec] ss:$16 sps:$4 sm:$0xff]  }
  0x6c   :  { %1470 = vmatpush1.bf16.msra.mxu1 %v2426_v18  ;;  %1389 = vmatprep.subr.bf16.mxu0 %v2437_v21  ;;  %v2516_v18 = vld [vmem:[#allocation2 + $0x2c8] ss:$16 sps:$4 sm:$0xff]  }
  0x6d   :  { %1471 = vmatprep.subr.bf16.mxu1 %v2434_v20  ;;  %v2524_v20 = vld [vmem:[#allocation2 + $0x2ac] ss:$16 sps:$4 sm:$0xff]   ;;  %v2519_v21 = vld [vmem:[#allocation2 + $0x4e8] ss:$16 sps:$4 sm:$0xff]  }
  0x6f   :  { %1390 = vmatpush1.bf16.msra.mxu0 %v2435_v23  ;;  %v2527_v23 = vld [vmem:[#allocation2 + $0x4cc] ss:$16 sps:$4 sm:$0xff]  }
  0x70   :  { %1472 = vmatpush1.bf16.msra.mxu1 %v2432_v22  ;;  %1391 = vmatprep.subr.bf16.mxu0 %v2443_v25  ;;  %v2522_v22 = vld [vmem:[#allocation2 + $0x2a8] ss:$16 sps:$4 sm:$0xff]  }
  0x71   :  { %1473 = vmatprep.subr.bf16.mxu1 %v2440_v24  ;;  %v2530_v24 = vld [vmem:[#allocation2 + $0x28c] ss:$16 sps:$4 sm:$0xff]   ;;  %v2525_v25 = vld [vmem:[#allocation2 + $0x4c8] ss:$16 sps:$4 sm:$0xff]  }
  0x73   :  { %1392 = vmatpush1.bf16.msra.mxu0 %v2441_v27  ;;  %v2533_v27 = vld [vmem:[#allocation2 + $0x4ac] ss:$16 sps:$4 sm:$0xff]  }
  0x74   :  { %1474 = vmatpush1.bf16.msra.mxu1 %v2438_v26  ;;  %1393 = vmatprep.subr.bf16.mxu0 %v2449_v29  ;;  %v2528_v26 = vld [vmem:[#allocation2 + $0x288] ss:$16 sps:$4 sm:$0xff]  }
  0x75   :  { %1475 = vmatprep.subr.bf16.mxu1 %v2446_v28  ;;  %v2536_v28 = vld [vmem:[#allocation2 + $0x26c] ss:$16 sps:$4 sm:$0xff]   ;;  %v2531_v29 = vld [vmem:[#allocation2 + $0x4a8] ss:$16 sps:$4 sm:$0xff]  }
  0x77   :  { %1394 = vmatpush1.bf16.msra.mxu0 %v2447_v31  ;;  %v2542_v31 = vld [vmem:[#allocation2 + $0x24c] ss:$16 sps:$4 sm:$0xff]  }
  0x78   :  { %1476 = vmatpush1.bf16.msra.mxu1 %v2444_v30  ;;  %1395 = vmatprep.subr.bf16.mxu0 %v2455_v34  ;;  %v2534_v30 = vld [vmem:[#allocation2 + $0x268] ss:$16 sps:$4 sm:$0xff]  }
  0x79   :  { %1477 = vmatprep.subr.bf16.mxu1 %v2452_v32  ;;  %v2537_v32 = vld [vmem:[#allocation2 + $0x488] ss:$16 sps:$4 sm:$0xff]  }
  0x7a   :  { %v2540_v34 = vld [vmem:[#allocation2 + $0x248] ss:$16 sps:$4 sm:$0xff]  }
  0x7b   :  { %1396 = vmatpush1.bf16.msra.mxu0 %v2453_v36  ;;  %v2543_v36 = vld [vmem:[#allocation2 + $0x468] ss:$16 sps:$4 sm:$0xff]  }
  0x7c   :  { %1478 = vmatpush1.bf16.msra.mxu1 %v2450_v35  ;;  %1397 = vmatprep.subr.bf16.mxu0 %v2461_v38  ;;  %v2545_v35 = vld [vmem:[#allocation2 + $0x46c] ss:$16 sps:$4 sm:$0xff]  }
  0x7d   :  { %1479 = vmatprep.subr.bf16.mxu1 %v2458_v37  ;;  %v2546_v37 = vld [vmem:[#allocation2 + $0x228] ss:$16 sps:$4 sm:$0xff]   ;;  %v2551_v38 = vld [vmem:[#allocation2 + $0x44c] ss:$16 sps:$4 sm:$0xff]  }
  0x7f   :  { %1398 = vmatpush2.bf16.msra.mxu0 %v2459_v40  ;;  %v2552_v40 = vld [vmem:[#allocation2 + $0x208] ss:$16 sps:$4 sm:$0xff]  }
  0x80   :  { %1480 = vmatpush1.bf16.msra.mxu1 %v2456_v39  ;;  %1399 = vmatprep.subr.bf16.mxu0 %v2467_v42  ;;  %v2554_v39 = vld [vmem:[#allocation2 + $0x20c] ss:$16 sps:$4 sm:$0xff]  }
  0x81   :  { %1481 = vmatprep.subr.bf16.mxu1 %v2464_v41  ;;  %v2557_v41 = vld [vmem:[#allocation2 + $0x42c] ss:$16 sps:$4 sm:$0xff]  }
  0x82   :  { %v2560_v42 = vld [vmem:[#allocation2 + $0x3ec] ss:$16 sps:$4 sm:$0xff]  }
  0x83   :  { %1400 = vmatpush2.bf16.msra.mxu0 %v2465_v44  ;;  %v2558_v44 = vld [vmem:[#allocation2 + $0x3e8] ss:$16 sps:$4 sm:$0xff]  }
  0x84   :  { %1482 = vmatpush1.bf16.msra.mxu1 %v2462_v43  ;;  %1401 = vmatprep.subr.bf16.mxu0 %v2473_v46  ;;  %v2555_v43 = vld [vmem:[#allocation2 + $0x428] ss:$16 sps:$4 sm:$0xff]   ;;  %v2566_v46 = vld [vmem:[#allocation2 + $0x3cc] ss:$16 sps:$4 sm:$0xff]  }
  0x85   :  { %1483 = vmatprep.subr.bf16.mxu1 %v2470_v45  ;;  %v2563_v45 = vld [vmem:[#allocation2 + $0x40c] ss:$16 sps:$4 sm:$0xff]  }
  0x87   :  { %1402 = vmatpush2.bf16.msra.mxu0 %v2471_v48  ;;  %v2564_v48 = vld [vmem:[#allocation2 + $0x3c8] ss:$16 sps:$4 sm:$0xff]  }
  0x88   :  { %1484 = vmatpush2.bf16.msra.mxu1 %v2468_v47  ;;  %1403 = vmatprep.subr.bf16.mxu0 %v2479_v50  ;;  %v2561_v47 = vld [vmem:[#allocation2 + $0x408] ss:$16 sps:$4 sm:$0xff]   ;;  %v2572_v50 = vld [vmem:[#allocation2 + $0x3ac] ss:$16 sps:$4 sm:$0xff]  }
  0x89   :  { %1485 = vmatprep.subr.bf16.mxu1 %v2476_v49  ;;  %v2569_v49 = vld [vmem:[#allocation2 + $0x5ec] ss:$16 sps:$4 sm:$0xff]  }
  0x8b   :  { %1404 = vmatpush2.bf16.msra.mxu0 %v2477_v53  ;;  %v2570_v53 = vld [vmem:[#allocation2 + $0x3a8] ss:$16 sps:$4 sm:$0xff]  }
  0x8c   :  { %1486 = vmatpush2.bf16.msra.mxu1 %v2474_v52  ;;  %1405 = vmatprep.subr.bf16.mxu0 %v2485_v55  ;;  %v2567_v52 = vld [vmem:[#allocation2 + $0x5e8] ss:$16 sps:$4 sm:$0xff]   ;;  %v2578_v55 = vld [vmem:[#allocation2 + $0x38c] ss:$16 sps:$4 sm:$0xff]  }
  0x8d   :  { %1487 = vmatprep.subr.bf16.mxu1 %v2482_v54  ;;  %v2575_v54 = vld [vmem:[#allocation2 + $0x5cc] ss:$16 sps:$4 sm:$0xff]  }
  0x8f   :  { %1406 = vmatpush2.bf16.msra.mxu0 %v2483_v57  ;;  %v2576_v57 = vld [vmem:[#allocation2 + $0x388] ss:$16 sps:$4 sm:$0xff]  }
  0x90   :  { %1488 = vmatpush2.bf16.msra.mxu1 %v2480_v56  ;;  %1407 = vmatprep.subr.bf16.mxu0 %v2491_v59  ;;  %v2573_v56 = vld [vmem:[#allocation2 + $0x5c8] ss:$16 sps:$4 sm:$0xff]   ;;  %v2584_v59 = vld [vmem:[#allocation2 + $0x36c] ss:$16 sps:$4 sm:$0xff]  }
  0x91   :  { %1489 = vmatprep.subr.bf16.mxu1 %v2488_v58  ;;  %v2581_v58 = vld [vmem:[#allocation2 + $0x5ac] ss:$16 sps:$4 sm:$0xff]  }
  0x93   :  { %1408 = vmatpush2.bf16.msra.mxu0 %v2489_v61  ;;  %v2582_v61 = vld [vmem:[#allocation2 + $0x368] ss:$16 sps:$4 sm:$0xff]  }
  0x94   :  { %1490 = vmatpush2.bf16.msra.mxu1 %v2486_v60  ;;  %1409 = vmatprep.subr.bf16.mxu0 %v2497_v63  ;;  %v2579_v60 = vld [vmem:[#allocation2 + $0x5a8] ss:$16 sps:$4 sm:$0xff]   ;;  %v2590_v63 = vld [vmem:[#allocation2 + $0x34c] ss:$16 sps:$4 sm:$0xff]  }
  0x95   :  { %1491 = vmatprep.subr.bf16.mxu1 %v2494_v62  ;;  %v2587_v62 = vld [vmem:[#allocation2 + $0x58c] ss:$16 sps:$4 sm:$0xff]  }
  0x97   :  { %1410 = vmatpush2.bf16.msra.mxu0 %v2495_v1  ;;  %v2588_v1 = vld [vmem:[#allocation2 + $0x348] ss:$16 sps:$4 sm:$0xff]  }
  0x98   :  { %1492 = vmatpush2.bf16.msra.mxu1 %v2492_v0  ;;  %1411 = vmatprep.subr.bf16.mxu0 %v2503_v3  ;;  %v2585_v0 = vld [vmem:[#allocation2 + $0x588] ss:$16 sps:$4 sm:$0xff]   ;;  %v2596_v3 = vld [vmem:[#allocation2 + $0x32c] ss:$16 sps:$4 sm:$0xff]  }
  0x99   :  { %1493 = vmatprep.subr.bf16.mxu1 %v2500_v2  ;;  %v2593_v2 = vld [vmem:[#allocation2 + $0x56c] ss:$16 sps:$4 sm:$0xff]  }
  0x9b   :  { %1412 = vmatpush2.bf16.msra.mxu0 %v2501_v7  ;;  %v2594_v7 = vld [vmem:[#allocation2 + $0x328] ss:$16 sps:$4 sm:$0xff]  }
  0x9c   :  { %1494 = vmatpush2.bf16.msra.mxu1 %v2498_v6  ;;  %1510 = vmatprep.subr.bf16.mxu0 %v2512_v9  ;;  %v2591_v6 = vld [vmem:[#allocation2 + $0x568] ss:$16 sps:$4 sm:$0xff]   ;;  %v2602_v9 = vld [vmem:[#allocation2 + $0x30c] ss:$16 sps:$4 sm:$0xff]  }
  0x9d   :  { %1495 = vmatprep.subr.bf16.mxu1 %v2509_v8  ;;  %v2599_v8 = vld [vmem:[#allocation2 + $0x54c] ss:$16 sps:$4 sm:$0xff]  }
  0x9e   :  { %1414 = vmatmul.mubr.bf16.vlgmr.msra.gmra.mxu0 %v2798_v10 }
  0x9f   :  { %1511 = vmatpush1.bf16.msra.mxu0 %v2510_v13  ;;  %1542 = vmatprep.mubr.bf16.mxu0 %v2764_v51  ;;  %v2539_v51 = vld [vmem:[#allocation2 + $0x48c] ss:$16 sps:$4 sm:$0xff]   ;;  %v2600_v13 = vld [vmem:[#allocation2 + $0x308] ss:$16 sps:$4 sm:$0xff]  }
  0xa0   :  { %1496 = vmatpush2.bf16.msra.mxu1 %v2507_v12  ;;  %1512 = vmatprep.subr.bf16.mxu0 %v2518_v16  ;;  %v2597_v12 = vld [vmem:[#allocation2 + $0x548] ss:$16 sps:$4 sm:$0xff]   ;;  %v2608_v16 = vld [vmem:[#allocation2 + $0x60c] ss:$16 sps:$4 sm:$0xff]  }
  0xa1   :  { %1497 = vmatprep.subr.bf16.mxu1 %v2515_v15  ;;  %v2605_v15 = vld [vmem:[#allocation2 + $0x52c] ss:$16 sps:$4 sm:$0xff]  }
  0xa3   :  { %1513 = vmatpush1.bf16.msra.mxu0 %v2516_v18  ;;  %v2606_v18 = vld [vmem:[#allocation2 + $0x608] ss:$16 sps:$4 sm:$0xff]  }
  0xa4   :  { %1498 = vmatpush2.bf16.msra.mxu1 %v2513_v17  ;;  %1514 = vmatprep.subr.bf16.mxu0 %v2524_v20  ;;  %v2603_v17 = vld [vmem:[#allocation2 + $0x528] ss:$16 sps:$4 sm:$0xff]  }
  0xa5   :  { %1553 = vmatprep.subr.bf16.mxu1 %v2521_v19  ;;  %v2611_v19 = vld [vmem:[#allocation2 + $0x50c] ss:$16 sps:$4 sm:$0xff]  }
  0xa6   :  { %v2612_v20 = vld [vmem:[#allocation5 + $0x78] sm:$0xff]  }
  0xa7   :  { %1500 = vmatmul.mubr.bf16.vlgmr.msra.gmra.mxu1 %v2771_v4  ;;  %1515 = vmatpush1.bf16.msra.mxu0 %v2522_v22  ;;  %v2548_v4 = vld [vmem:[#allocation2 + $0x22c] ss:$16 sps:$4 sm:$0xff]  }
  0xa8   :  { %1554 = vmatpush1.bf16.msra.mxu1 %v2519_v21  ;;  %1516 = vmatprep.subr.bf16.mxu0 %v2530_v24  ;;  %v2609_v21 = vld [vmem:[#allocation2 + $0x508] ss:$16 sps:$4 sm:$0xff]   ;;  %v2615_v24 = vld [vmem:[#allocation5 + $0x30] sm:$0xff]  }
  0xa9   :  { %1555 = vmatprep.subr.bf16.mxu1 %v2527_v23  ;;  %1585 = vmatprep.mubr.bf16.mxu1 %v2792_v33  ;;  %v2549_v33 = vld [vmem:[#allocation2 + $0x448] ss:$16 sps:$4 sm:$0xff]   ;;  %v2614_v23 = vld [vmem:[#allocation5 + $0x70] sm:$0xff]  }
  0xaa   :  { %v2613_v22 = vld [vmem:[#allocation5 + $0x38] sm:$0xff]  }
  0xab   :  { %1517 = vmatpush1.bf16.msra.mxu0 %v2528_v26  ;;  %v2618_v26 = vld [vmem:[#allocation5 + $0x60] sm:$0xff]  }
  0xac   :  { %1556 = vmatpush1.bf16.msra.mxu1 %v2525_v25  ;;  %1518 = vmatprep.subr.bf16.mxu0 %v2536_v28  ;;  %v2616_v25 = vld [vmem:[#allocation5 + $0x68] sm:$0xff]   ;;  %v2629_v28 = vld [vmem:[#allocation5 + $0xb8] sm:$0xff]  }
  0xad   :  { %1557 = vmatprep.subr.bf16.mxu1 %v2533_v27  ;;  %v2628_v27 = vld [vmem:[#allocation5 + $0xf8] sm:$0xff]  }
  0xaf   :  { %1519 = vmatpush1.bf16.msra.mxu0 %v2534_v30  ;;  %v2620_v30 = vld [vmem:[#allocation5 + $0x58] sm:$0xff]  }
  0xb0   :  { %1558 = vmatpush1.bf16.msra.mxu1 %v2531_v29  ;;  %1520 = vmatprep.subr.bf16.mxu0 %v2542_v31  ;;  %v2619_v29 = vld [vmem:[#allocation5 + $0x20] sm:$0xff]   ;;  %v2622_v31 = vld [vmem:[#allocation5 + $0x50] sm:$0xff]  }
  0xb1   :  { %1559 = vmatprep.subr.bf16.mxu1 %v2539_v51  ;;  %v2621_v51 = vld [vmem:[#allocation5 + $0x18] sm:$0xff]  }
  0xb3   :  { %1521 = vmatpush1.bf16.msra.mxu0 %v2540_v34  ;;  %v2624_v34 = vld [vmem:[#allocation5 + $0x48] sm:$0xff]  }
  0xb4   :  { %1560 = vmatpush1.bf16.msra.mxu1 %v2537_v32  ;;  %1522 = vmatprep.subr.bf16.mxu0 %v2548_v4  ;;  %v2623_v32 = vld [vmem:[#allocation5 + $0x10] sm:$0xff]   ;;  %v2626_v4 = vld [vmem:[#allocation5 + $0x40] sm:$0xff]  }
  0xb5   :  { %1561 = vmatprep.subr.bf16.mxu1 %v2545_v35  ;;  %v2625_v35 = vld [vmem:[#allocation5 + $0x8] sm:$0xff]  }
  0xb7   :  { %1523 = vmatpush1.bf16.msra.mxu0 %v2546_v37  ;;  %v2633_v37 = vld [vmem:[#allocation5 + $0xa8] sm:$0xff]  }
  0xb8   :  { %1562 = vmatpush1.bf16.msra.mxu1 %v2543_v36  ;;  %1524 = vmatprep.subr.bf16.mxu0 %v2554_v39  ;;  %v2627_v36 = vld [vmem:[#allocation5] sm:$0xff]  }
  0xb9   :  { %1563 = vmatprep.subr.bf16.mxu1 %v2551_v38  ;;  %v2634_v38 = vld [vmem:[#allocation5 + $0xe0] sm:$0xff]  }
  0xba   :  { %v2635_v39 = vld [vmem:[#allocation5 + $0xa0] sm:$0xff]  }
  0xbb   :  { %1525 = vmatpush1.bf16.msra.mxu0 %v2552_v40  ;;  %v2637_v40 = vld [vmem:[#allocation5 + $0x98] sm:$0xff]  }
  0xbc   :  { %1564 = vmatpush1.bf16.msra.mxu1 %v2549_v33  ;;  %1526 = vmatprep.subr.bf16.mxu0 %v2560_v42  ;;  %v2636_v33 = vld [vmem:[#allocation5 + $0xd8] sm:$0xff]   ;;  %v2639_v42 = vld [vmem:[#allocation5 + $0x90] sm:$0xff]  }
  0xbd   :  { %1565 = vmatprep.subr.bf16.mxu1 %v2557_v41  ;;  %v2638_v41 = vld [vmem:[#allocation5 + $0xd0] sm:$0xff]  }
  0xbf   :  { %1527 = vmatpush2.bf16.msra.mxu0 %v2558_v44  ;;  %v2641_v44 = vld [vmem:[#allocation5 + $0x88] sm:$0xff]  }
  0xc0   :  { %1566 = vmatpush1.bf16.msra.mxu1 %v2555_v43  ;;  %1528 = vmatprep.subr.bf16.mxu0 %v2566_v46  ;;  %v2640_v43 = vld [vmem:[#allocation5 + $0xc8] sm:$0xff]   ;;  %v2643_v46 = vld [vmem:[#allocation5 + $0x80] sm:$0xff]  }
  0xc1   :  { %1567 = vmatprep.subr.bf16.mxu1 %v2563_v45  ;;  %v2642_v45 = vld [vmem:[#allocation5 + $0xc0] sm:$0xff]  }
  0xc3   :  { %1529 = vmatpush2.bf16.msra.mxu0 %v2564_v48  ;;  %v256_v48 = vlaneseq }
  0xc4   :  { %1568 = vmatpush1.bf16.msra.mxu1 %v2561_v47  ;;  %1530 = vmatprep.subr.bf16.mxu0 %v2572_v50 }
  0xc5   :  { %1569 = vmatprep.subr.bf16.mxu1 %v2569_v49  ;;  %v257_v50 = vshrl.u32 %v256_v48, 7 }
  0xc7   :  { %1531 = vmatpush2.bf16.msra.mxu0 %v2570_v53 }
  0xc8   :  { %1570 = vmatpush2.bf16.msra.mxu1 %v2567_v52  ;;  %1532 = vmatprep.subr.bf16.mxu0 %v2578_v55  ;;  %v258_v55 = vsub.s32 0, %v257_v50 }
  0xc9   :  { %1571 = vmatprep.subr.bf16.mxu1 %v2575_v54  ;;  %v262_v54 = vsub.s32 1, %v257_v50 }
  0xcb   :  { %1533 = vmatpush2.bf16.msra.mxu0 %v2576_v57  ;;  %v254_v57 = vld [vmem:[%s2820_s2] sm:$0xf] }
  0xcc   :  { %1572 = vmatpush2.bf16.msra.mxu1 %v2573_v56  ;;  %1534 = vmatprep.subr.bf16.mxu0 %v2584_v59  ;;  %v263_v59 = vrot.slane %v254_v57, %v262_v54 }
  0xcd   :  { %1573 = vmatprep.subr.bf16.mxu1 %v2581_v58 }
  0xcf   :  { %1535 = vmatpush2.bf16.msra.mxu0 %v2582_v61 }
  0xd0   :  { %1574 = vmatpush2.bf16.msra.mxu1 %v2579_v60  ;;  %1536 = vmatprep.subr.bf16.mxu0 %v2590_v63  ;;  %v259_v60 = vrot.slane %v254_v57, %v258_v55 }
  0xd1   :  { %1575 = vmatprep.subr.bf16.mxu1 %v2587_v62 }
  0xd3   :  { %1537 = vmatpush2.bf16.msra.mxu0 %v2588_v1 }
  0xd4   :  { %1576 = vmatpush2.bf16.msra.mxu1 %v2585_v0  ;;  %1538 = vmatprep.subr.bf16.mxu0 %v2596_v3 }
  0xd5   :  { %1577 = vmatprep.subr.bf16.mxu1 %v2593_v2 }
  0xd7   :  { %1539 = vmatpush2.bf16.msra.mxu0 %v2594_v7 }
  0xd8   :  { %1578 = vmatpush2.bf16.msra.mxu1 %v2591_v6  ;;  %1540 = vmatprep.subr.bf16.mxu0 %v2602_v9 }
  0xd9   :  { %1579 = vmatprep.subr.bf16.mxu1 %v2599_v8 }
  0xdb   :  { %1541 = vmatpush2.bf16.msra.mxu0 %v2600_v13 }
  0xdc   :  { %1580 = vmatpush2.bf16.msra.mxu1 %v2597_v12  ;;  %1610 = vmatprep.subr.bf16.mxu0 %v2608_v16 }
  0xdd   :  { %1581 = vmatprep.subr.bf16.mxu1 %v2605_v15 }
  0xde   :  { %1543 = vmatmul.mubr.bf16.vlgmr.msra.gmra.mxu0 %v2776_v5  ;;  %v2617_v5 = vld [vmem:[#allocation5 + $0x28] sm:$0xff]  }
  0xdf   :  { %1611 = vmatpush1.bf16.msra.mxu0 %v2606_v18  ;;  %1628 = vmatprep.mubr.bf16.mxu0 %v2716_v11  ;;  %v2630_v11 = vld [vmem:[#allocation5 + $0xf0] sm:$0xff]  }
  0xe0   :  { %1582 = vmatpush2.bf16.msra.mxu1 %v2603_v17  ;;  %2254 = vmatprep.subr.bf16.mxu0 %v2612_v20 }
  0xe1   :  { %1583 = vmatprep.subr.bf16.mxu1 %v2611_v19 }
  0xe4   :  { %1584 = vmatpush2.bf16.msra.mxu1 %v2609_v21 }
  0xe5   :  { %2276 = vmatprep.subr.bf16.mxu1 %v2628_v27 }
  0xe6   :  { %2220 = vmatmul.mubr.msk.bf16.vlgmr.msra.gmra.mxu0 %vm1291_vm0, %v2784_v14  ;;  %v2632_v14 = vld [vmem:[#allocation5 + $0xe8] sm:$0xff]  }
  0xe7   :  { %1586 = vmatmul.mubr.bf16.vlgmr.msra.gmra.mxu1 %v2798_v10  ;;  %2255 = vmatpush3.bf16.msra.mxu0 %v2613_v22  ;;  %v2631_v10 = vld [vmem:[#allocation5 + $0xb0] sm:$0xff]  }
  0xe8   :  { %2256 = vmatprep.subr.bf16.mxu0 %v2614_v23  ;;  %2277 = vmatpush3.bf16.msra.mxu1 %v2629_v28 }
  0xe9   :  { %2278 = vmatprep.subr.bf16.mxu1 %v2630_v11 }
  0xeb   :  { %2257 = vmatpush3.bf16.msra.mxu0 %v2615_v24 }
  0xec   :  { %2258 = vmatprep.subr.bf16.mxu0 %v2616_v25  ;;  %2279 = vmatpush3.bf16.msra.mxu1 %v2631_v10 }
  0xed   :  { %2280 = vmatprep.subr.bf16.mxu1 %v2632_v14 }
  0xef   :  { %2259 = vmatpush3.bf16.msra.mxu0 %v2617_v5 }
  0xf0   :  { %2260 = vmatprep.subr.bf16.mxu0 %v2618_v26  ;;  %2281 = vmatpush3.bf16.msra.mxu1 %v2633_v37 }
  0xf1   :  { %2282 = vmatprep.subr.bf16.mxu1 %v2634_v38 }
  0xf3   :  { %2261 = vmatpush3.bf16.msra.mxu0 %v2619_v29 }
  0xf4   :  { %2262 = vmatprep.subr.bf16.mxu0 %v2620_v30  ;;  %2283 = vmatpush3.bf16.msra.mxu1 %v2635_v39 }
  0xf5   :  { %2284 = vmatprep.subr.bf16.mxu1 %v2636_v33 }
  0xf7   :  { %2263 = vmatpush3.bf16.msra.mxu0 %v2621_v51 }
  0xf8   :  { %2264 = vmatprep.subr.bf16.mxu0 %v2622_v31  ;;  %2285 = vmatpush3.bf16.msra.mxu1 %v2637_v40  ;;  %v270_v31 = vsub.s32 3, %v257_v50 }
  0xf9   :  { %2286 = vmatprep.subr.bf16.mxu1 %v2638_v41 }
  0xfb   :  { %2265 = vmatpush3.bf16.msra.mxu0 %v2623_v32  ;;  %v266_v32 = vsub.s32 2, %v257_v50 }
  0xfc   :  { %2266 = vmatprep.subr.bf16.mxu0 %v2624_v34  ;;  %2287 = vmatpush3.bf16.msra.mxu1 %v2639_v42 }
  0xfd   :  { %2288 = vmatprep.subr.bf16.mxu1 %v2640_v43  ;;  %v267_v37 = vrot.slane %v254_v57, %v266_v32 }
  0xff   :  { %2267 = vmatpush3.bf16.msra.mxu0 %v2625_v35 }
 0x100   :  { %2268 = vmatprep.subr.bf16.mxu0 %v2626_v4  ;;  %2289 = vmatpush3.bf16.msra.mxu1 %v2641_v44 }
 0x101   :  { %2290 = vmatprep.subr.bf16.mxu1 %v2642_v45 }
 0x103   :  { %2269 = vmatpush3.bf16.msra.mxu0 %v2627_v36  ;;  %v271_v36 = vrot.slane %v254_v57, %v270_v31 }
 0x104   :  { %2291 = vmatpush3.bf16.msra.mxu1 %v2643_v46 }
 0x11e   :  { %v1329_v52 = vpop.f32.mrf.mxu0 }
 0x11f   :  { %v1372_v47 = vpop.f32.mrf.mxu1  ;;  %v1330_v0 = vadd.f32 %v1329_v52, %v259_v60 }
 0x120   :  { %v1331_v56 = vpop.f32.mrf.mxu0 }
 0x121   :  { %v1374_v49 = vpop.f32.mrf.mxu1  ;;  %v1332_v63 = vadd.f32 %v1331_v56, %v263_v59  ;;  %v1373_v9 = vadd.f32 %v1372_v47, %v1330_v0 }
 0x122   :  { %v1333_v61 = vpop.f32.mrf.mxu0 }
 0x123   :  { %v1376_v53 = vpop.f32.mrf.mxu1  ;;  %v1334_v2 = vadd.f32 %v1333_v61, %v259_v60  ;;  %v1375_v7 = vadd.f32 %v1374_v49, %v1332_v63 }
 0x124   :  { %v1335_v1 = vpop.f32.mrf.mxu0 }
 0x125   :  { %v1378_v58 = vpop.f32.mrf.mxu1  ;;  %v1336_v8 = vadd.f32 %v1335_v1, %v263_v59  ;;  %v1377_v13 = vadd.f32 %v1376_v53, %v1334_v2 }
 0x127   :  { %v1458_v62 = vpop.f32.mrf.mxu1  ;;  %v1379_v19 = vadd.f32 %v1378_v58, %v1336_v8 }
 0x129   :  { %v1460_v3 = vpop.f32.mrf.mxu1 }
 0x12b   :  { %v1462_v16 = vpop.f32.mrf.mxu1 }
 0x12d   :  { %v1464_v25 = vpop.f32.mrf.mxu1 }
 0x15e   :  { %v1415_v6 = vpop.f32.mrf.mxu0 }
 0x15f   :  { %v1416_v17 = vadd.f32 %v1415_v6, %v1373_v9 }
 0x160   :  { %v1417_v12 = vpop.f32.mrf.mxu0 }
 0x161   :  { %v1418_v15 = vadd.f32 %v1417_v12, %v1375_v7  ;;  %v1459_v5 = vadd.f32 %v1458_v62, %v1416_v17 }
 0x162   :  { %v1419_v18 = vpop.f32.mrf.mxu0 }
 0x163   :  { %v1420_v20 = vadd.f32 %v1419_v18, %v1377_v13  ;;  %v1461_v22 = vadd.f32 %v1460_v3, %v1418_v15  ;;  %v1639_v29 = vmax.f32 %v1459_v5, 0.0 }
 0x164   :  { %v1421_v21 = vpop.f32.mrf.mxu0 }
 0x165   :  { %v1463_v23 = vadd.f32 %v1462_v16, %v1420_v20  ;;  %v1422_v24 = vadd.f32 %v1421_v21, %v1379_v19  ;;  %v1640_v28 = vmax.f32 %v1461_v22, 0.0  ;;  %v2221_v16 = vld [vmem:[%s2822_s4] ss:$0 sm:$0xff] }
 0x167   :  { %v1465_v26 = vadd.f32 %v1464_v25, %v1422_v24  ;;  %v1643_v27 = vmax.f32 %v1463_v23, 0.0  ;;  %v1501_v14 = vpop.f32.mrf.mxu1 }
 0x168   :  { %v1502_v41 = vadd.f32 %v1501_v14, %v267_v37 }
 0x169   :  { %v1644_v11 = vmax.f32 %v1465_v26, 0.0  ;;  %v1647_v10 = vpack.c.bf16 %v1643_v27, %v1639_v29  ;;  %v1503_v51 = vpop.f32.mrf.mxu1 }
 0x16a   :  { %v1504_v40 = vadd.f32 %v1503_v51, %v271_v36 }
 0x16b   :  { %v1648_v30 = vpack.c.bf16 %v1644_v11, %v1640_v28  ;;  %v1505_v35 = vpop.f32.mrf.mxu1 }
 0x16c   :  { %v1506_v44 = vadd.f32 %v1505_v35, %v267_v37 }
 0x16d   :  { %1946 = vmatprep.mubr.bf16.mxu0 %v1648_v30  ;;  %v1507_v39 = vpop.f32.mrf.mxu1 }
 0x16e   :  { %1947 = vmatmul.mubr.bf16.vlgmr.msra.gmra.mxu0 %v1647_v10  ;;  %v1508_v49 = vadd.f32 %v1507_v39, %v271_v36 }
 0x19e   :  { %v1544_v34 = vpop.f32.mrf.mxu0 }
 0x19f   :  { %v1545_v46 = vadd.f32 %v1544_v34, %v1502_v41 }
 0x1a0   :  { %v1546_v4 = vpop.f32.mrf.mxu0 }
 0x1a1   :  { %v1547_v45 = vadd.f32 %v1546_v4, %v1504_v40 }
 0x1a2   :  { %v1548_v38 = vpop.f32.mrf.mxu0 }
 0x1a3   :  { %v1549_v52 = vadd.f32 %v1548_v38, %v1506_v44 }
 0x1a4   :  { %v1550_v33 = vpop.f32.mrf.mxu0 }
 0x1a5   :  { %v1551_v56 = vadd.f32 %v1550_v33, %v1508_v49 }
 0x1a6   :  { %v1630_v43 = vpop.f32.mrf.mxu0 }
 0x1a7   :  { %v1587_v42 = vpop.f32.mrf.mxu1 }
 0x1a8   :  { %v1632_v48 = vpop.f32.mrf.mxu0  ;;  %v1588_v53 = vadd.f32 %v1587_v42, %v1545_v46 }
 0x1a9   :  { %v1589_v47 = vpop.f32.mrf.mxu1 }
 0x1aa   :  { %v1590_v50 = vadd.f32 %v1589_v47, %v1547_v45  ;;  %v1634_v55 = vpop.f32.mrf.mxu0  ;;  %v1631_v63 = vadd.f32 %v1630_v43, %v1588_v53 }
 0x1ab   :  { %v1591_v54 = vpop.f32.mrf.mxu1 }
 0x1ac   :  { %v1592_v57 = vadd.f32 %v1591_v54, %v1549_v52  ;;  %v1636_v59 = vpop.f32.mrf.mxu0  ;;  %v1633_v60 = vadd.f32 %v1632_v48, %v1590_v50  ;;  %v1641_v6 = vmax.f32 %v1631_v63, 0.0 }
 0x1ad   :  { %v1593_v58 = vpop.f32.mrf.mxu1 }
 0x1ae   :  { %v1635_v61 = vadd.f32 %v1634_v55, %v1592_v57  ;;  %v1594_v62 = vadd.f32 %v1593_v58, %v1551_v56  ;;  %v1642_v2 = vmax.f32 %v1633_v60, 0.0 }
 0x1b0   :  { %v1637_v0 = vadd.f32 %v1636_v59, %v1594_v62  ;;  %v1645_v1 = vmax.f32 %v1635_v61, 0.0 }
 0x1b2   :  { %v1646_v3 = vmax.f32 %v1637_v0, 0.0  ;;  %v1649_v8 = vpack.c.bf16 %v1645_v1, %v1641_v6 }
 0x1b4   :  { %v1650_v7 = vpack.c.bf16 %v1646_v3, %v1642_v2 }
 0x1b6   :  { %1987 = vmatprep.mubr.bf16.mxu1 %v1650_v7 }
 0x1b7   :  { %1988 = vmatmul.mubr.bf16.vlgmr.msra.gmra.mxu1 %v1649_v8 }
 0x22e   :  { %v2270_v9 = vpop.f32.mrf.mxu0 }
 0x230   :  { %v2271_v12 = vpop.f32.mrf.mxu0 }
 0x231   :  { %v2272_v15 = vadd.f32 %v2271_v12, %v2270_v9 }
 0x232   :  { %v2273_v13 = vpop.f32.mrf.mxu0 }
 0x233   :  { %v1949_v20 = vadd.f32 %v2272_v15, %v2221_v16 }
 0x234   :  { %v2274_v17 = vpop.f32.mrf.mxu0 }
 0x235   :  { %v2275_v21 = vadd.f32 %v2274_v17, %v2273_v13 }
 0x237   :  { %v1952_v5 = vadd.f32 %v2275_v21, %v2221_v16 }
 0x277   :  { %v2292_v18 = vpop.f32.mrf.mxu1 }
 0x279   :  { %v2293_v19 = vpop.f32.mrf.mxu1 }
 0x27a   :  { %v2294_v22 = vadd.f32 %v2293_v19, %v2292_v18 }
 0x27b   :  { %v2295_v23 = vpop.f32.mrf.mxu1 }
 0x27c   :  { %v1990_v24 = vadd.f32 %v2294_v22, %v1949_v20 }
 0x27d   :  { %v2296_v25 = vpop.f32.mrf.mxu1 }
 0x27e   :  { %1996 = vst [vmem:[#allocation7] sm:$0xff] %v1990_v24  ;;  %v2297_v26 = vadd.f32 %v2296_v25, %v2295_v23 }
 0x280   :  { %v1993_v27 = vadd.f32 %v2297_v26, %v1952_v5 }
 0x282   :  { %1997 = vst [vmem:[#allocation7 + $0x8] sm:$0xff] %v1993_v27 }
 0x283   :  { %2695 = shalt.err (!%p2692_p0)
}
 0x284   :  { %s2718_s4 = smov 128   ;;  %s2719_s24 = smov 8  }
 0x285   :  { %2009 = dma.vmem_to_hbm [thread:$0]  %s2004_s22, 256, %s2823_s5, [#allocation4], %s2718_s4, %s2718_s4, %s2719_s24  }
 0x286   :  { %2708 = dma.done.wait [#allocation4], 256  }
 0x287   :  { %2709 = vsyncadd [#allocation4], 4294967040 }
 0x288   :  { %2013 = vsyncpa [#allocation3], 1 }
 0x289   :  { %2014 = vsyncpa [#allocation6], 1 }
 0x28a   :  { %2015 = vsyncpa [#allocation4], 1 }

</bundles_post_ra>
